<compile_context>
chip_gen: v6e
topology: v6e:2x2x1
jax: 0.10.0
libtpu: 0.0.40
codegen_flags: <defaults>
</compile_context>

<pallas_src>
import functools

import jax
import jax.numpy as jnp
from jax import lax
from jax.experimental import pallas as pl
from jax.experimental.pallas import tpu as pltpu


_MAX_TILE_ROWS = 8192
_VMEM_LIMIT_BYTES = 32 * 1024 * 1024


def _device_info():
    """Returns (num_tensorcores, target_block_bytes) for the current backend."""
    try:
        kind = jax.devices()[0].device_kind.lower()
    except Exception:
        kind = ""
    is_v7 = ("v7" in kind) or ("tpu7" in kind) or ("7x" in kind)
    num_cores = 2 if is_v7 else 1
    # v7x has half the VMEM (64 MiB) -> smaller per-block budget.
    target_block_bytes = (4 << 20) if is_v7 else (8 << 20)
    return num_cores, target_block_bytes


def _sublane_multiple(itemsize: int) -> int:
    # Sub-32-bit dtypes pack along sublanes: 8 rows (4B), 16 (2B), 32 (1B).
    return max(8, 32 // max(1, itemsize))


def _pick_hw_tile(hw: int, itemsize: int, sub: int, target_bytes: int) -> int:
    """Lane-dense tile along the flattened H*W axis."""
    if hw * sub * itemsize <= target_bytes:
        return hw                               # full extent (always legal); typical case
    cap = max(128, (target_bytes // (sub * itemsize)) // 128 * 128)
    if hw % 128 == 0:
        best = 128
        for t in range(128, min(hw, cap) + 1, 128):
            if hw % t == 0:
                best = t
        return best
    # hw large and not a multiple of 128: tile anyway; kernel masks the tail lanes.
    return min(cap, ((hw + 127) // 128) * 128)


def _pick_row_tile(rows: int, tile_hw: int, itemsize: int, sub: int,
                   target_bytes: int, num_cores: int) -> int:
    """Row tile: sublane-aligned, block bytes <= budget, 2-TC-balanced on v7x."""
    def cdiv(a, b):
        return -(-a // b)

    def round_up(a, b):
        return cdiv(a, b) * b

    budget_rows = max(sub, target_bytes // max(1, tile_hw * itemsize))
    cap = max(sub, (min(budget_rows, _MAX_TILE_ROWS) // sub) * sub)
    if rows <= cap:
        tile_r = round_up(rows, sub)            # all rows in one (overhanging) block
    else:
        tile_r = cap

    if num_cores >= 2:
        nblk = cdiv(rows, tile_r)
        blk_bytes = tile_r * tile_hw * itemsize
        if nblk == 1 and rows > sub and blk_bytes >= (2 << 20):
            # Split the single block in two so both TensorCores stream HBM.
            cand = max(sub, round_up(cdiv(rows, 2), sub))
            if cdiv(rows, cand) == 2:
                tile_r = cand
        elif nblk > 1 and nblk % 2 == 1:
            # Bump to the next even block count (balanced 2-TC split, blocks
            # shrink only by a factor nblk/(nblk+1)).
            cand = max(sub, round_up(cdiv(rows, nblk + 1), sub))
            if cdiv(rows, cand) % 2 == 0:
                tile_r = cand
    return tile_r


def _make_global_pool_kernel(pool_type: str, inv_hw: float, hw: int, tile_hw: int):
    """Kernel over one (TILE_R, TILE_HW) block of the flattened (N*C, H*W) view."""
    needs_mask = (hw % tile_hw) != 0

    def kernel(x_ref, o_ref, acc_ref):
        k = pl.program_id(1)

        @pl.when(k == 0)
        def _init():
            acc_ref[...] = jnp.zeros_like(acc_ref)

        x = x_ref[...].astype(jnp.float32)                  # (TILE_R, TILE_HW)
        if needs_mask:
            # Zero the lanes past the true H*W extent (zeros are sum-neutral;
            # inv_hw below uses the true H*W).
            lane = lax.broadcasted_iota(jnp.int32, x.shape, dimension=1)
            x = jnp.where((k * tile_hw + lane) < hw, x, jnp.float32(0.0))

        if pool_type == "rms":
            part = jnp.sum(x * x, axis=-1, keepdims=True)
        elif pool_type == "abs":
            part = jnp.sum(jnp.abs(x), axis=-1, keepdims=True)
        else:  # 'mean'
            part = jnp.sum(x, axis=-1, keepdims=True)
        acc_ref[...] += part

        @pl.when(k == pl.num_programs(1) - 1)
        def _finalize():
            m = acc_ref[...] * jnp.float32(inv_hw)
            if pool_type == "rms":
                m = lax.rsqrt(m)                            # matches torch's m ** (-0.5)
            o_ref[...] = m.astype(o_ref.dtype)

    return kernel


@functools.partial(jax.jit, static_argnames=("pool_type", "keep_dim"))
def global_pool(x: jax.Array, pool_type: str = "mean", keep_dim: bool = False):
    """Pallas implementation of GlobalPool.forward for a 4-D NCHW tensor."""
    assert x.ndim == 4, f"Got: {x.shape}"
    N, C, H, W = x.shape
    rows = N * C
    hw = H * W
    itemsize = x.dtype.itemsize

    num_cores, target_bytes = _device_info()
    sub = _sublane_multiple(itemsize)

    # Free, contiguous reshape: lane axis becomes H*W (lane-dense DMA + reduce).
    x2 = x.reshape(rows, hw)

    tile_hw = _pick_hw_tile(hw, itemsize, sub, target_bytes)
    tile_r = _pick_row_tile(rows, tile_hw, itemsize, sub, target_bytes, num_cores)
    grid = (pl.cdiv(rows, tile_r), pl.cdiv(hw, tile_hw))

    cost = pl.CostEstimate(
        flops=2 * rows * hw,
        transcendentals=rows if pool_type == "rms" else 0,
        bytes_accessed=rows * hw * itemsize + rows * itemsize,
    )

    out = pl.pallas_call(
        _make_global_pool_kernel(pool_type, 1.0 / float(hw), hw, tile_hw),
        out_shape=jax.ShapeDtypeStruct((rows, 1), x.dtype),
        grid_spec=pltpu.PrefetchScalarGridSpec(
            num_scalar_prefetch=0,
            grid=grid,
            in_specs=[pl.BlockSpec((tile_r, tile_hw), lambda i, k: (i, k))],
            out_specs=pl.BlockSpec((tile_r, 1), lambda i, k: (i, 0)),
            scratch_shapes=[pltpu.VMEM((tile_r, 1), jnp.float32)],
        ),
        compiler_params=pltpu.CompilerParams(
            dimension_semantics=("parallel", "arbitrary"),
            vmem_limit_bytes=_VMEM_LIMIT_BYTES,
        ),
        cost_estimate=cost,
    )(x2)

    out = out.reshape(N, C)
    if keep_dim:
        # keepdim=True in torch.mean(dim=[-2, -1]) -> shape (N, C, 1, 1)
        out = out.reshape(N, C, 1, 1)
    return out


def _global_pool_ref(x, pool_type="mean", keep_dim=False):
    """Pure-JAX reference mirroring the PyTorch module (f32 math)."""
    xf = x.astype(jnp.float32)
    if pool_type == "rms":
        m = jnp.mean(xf ** 2, axis=(-2, -1), keepdims=keep_dim)
        return (m ** (-0.5)).astype(x.dtype)
    elif pool_type == "abs":
        return jnp.mean(jnp.abs(xf), axis=(-2, -1), keepdims=keep_dim).astype(x.dtype)
    else:
        return jnp.mean(xf, axis=(-2, -1), keepdims=keep_dim).astype(x.dtype)


if __name__ == "__main__":
    key = jax.random.PRNGKey(0)
    # NCHW inputs consistent with the module's 4-D assertion; +0.1 keeps the
    # 'rms' variant ((mean x^2) ** -0.5) finite.
    cases = [
        (jax.random.normal(key, (2, 4, 16, 16), dtype=jnp.float32) + 0.1, 1e-5),
        (jax.random.normal(key, (2, 4, 7, 7), dtype=jnp.float32) + 0.1, 1e-5),
        (jax.random.normal(key, (2, 4, 16, 16), dtype=jnp.bfloat16) + 0.1, 2e-2),
    ]

    ok = True
    for x, tol in cases:
        for pool_type in ("mean", "rms", "abs"):
            for keep_dim in (False, True):
                got = jax.block_until_ready(global_pool(x, pool_type, keep_dim))
                want = _global_pool_ref(x, pool_type, keep_dim)
                ok &= got.shape == want.shape
                ok &= bool(jnp.allclose(got.astype(jnp.float32),
                                        want.astype(jnp.float32),
                                        rtol=tol, atol=tol))

    if ok:
        print("KERNEL_OK")
    else:
        print("KERNEL_MISMATCH")
</pallas_src>

<mosaic_0001>
module attributes {stable_mosaic.version = 11 : i64} {
  func.func @kernel(%arg0: i32, %arg1: i32, %arg2: memref<8x256xf32, #tpu.memory_space<vmem>>, %arg3: memref<8x1xf32, #tpu.memory_space<vmem>>, %arg4: memref<8x1xf32, #tpu.memory_space<vmem>>) attributes {dimension_semantics = [#tpu.dimension_semantics<parallel>, #tpu.dimension_semantics<arbitrary>], iteration_bounds = array<i64: 1, 1>, scalar_prefetch = 0 : i64, scratch_operands = 1 : i64, tpu.core_type = #tpu.core_type<tc>, window_params = [{transform_indices = @transform_0, window_bounds = array<i64: 8, 256>}, {transform_indices = @transform_1, window_bounds = array<i64: 8, 1>}]} {
    %c0_i32 = arith.constant 0 : i32
    %0 = arith.cmpi eq, %arg1, %c0_i32 : i32
    %1 = arith.extui %0 : i1 to i32
    %c0_i32_0 = arith.constant 0 : i32
    %2 = arith.cmpi ne, %1, %c0_i32_0 : i32
    scf.if %2 {
      %cst_8 = arith.constant 0.000000e+00 : f32
      %12 = vector.broadcast %cst_8 : f32 to vector<8x1xf32>
      %c0_9 = arith.constant 0 : index
      %c0_10 = arith.constant 0 : index
      %13 = vector.load %arg4[%c0_9, %c0_10] : memref<8x1xf32, #tpu.memory_space<vmem>>, vector<8x1xf32>
      tpu.vector_store %arg4[%c0_9, %c0_10], %12 {strides = array<i32>} : memref<8x1xf32, #tpu.memory_space<vmem>>, vector<8x1xf32>,
    } else {
    }
    %c0 = arith.constant 0 : index
    %c0_1 = arith.constant 0 : index
    %3 = vector.load %arg2[%c0, %c0_1] : memref<8x256xf32, #tpu.memory_space<vmem>>, vector<8x256xf32>
    %cst = arith.constant dense<0.000000e+00> : vector<8xf32>
    %4 = vector.multi_reduction <add>, %3, %cst [1] : vector<8x256xf32> to vector<8xf32>
    %5 = vector.shape_cast %4 : vector<8xf32> to vector<8x1xf32>
    %c0_2 = arith.constant 0 : index
    %c0_3 = arith.constant 0 : index
    %6 = vector.load %arg4[%c0_2, %c0_3] : memref<8x1xf32, #tpu.memory_space<vmem>>, vector<8x1xf32>
    %7 = arith.addf %6, %5 : vector<8x1xf32>
    %c0_4 = arith.constant 0 : index
    %c0_5 = arith.constant 0 : index
    %8 = vector.load %arg4[%c0_4, %c0_5] : memref<8x1xf32, #tpu.memory_space<vmem>>, vector<8x1xf32>
    tpu.vector_store %arg4[%c0_4, %c0_5], %7 {strides = array<i32>} : memref<8x1xf32, #tpu.memory_space<vmem>>, vector<8x1xf32>,
    %c0_i32_6 = arith.constant 0 : i32
    %9 = arith.cmpi eq, %arg1, %c0_i32_6 : i32
    %10 = arith.extui %9 : i1 to i32
    %c0_i32_7 = arith.constant 0 : i32
    %11 = arith.cmpi ne, %10, %c0_i32_7 : i32
    scf.if %11 {
      %c0_8 = arith.constant 0 : index
      %c0_9 = arith.constant 0 : index
      %12 = vector.load %arg4[%c0_8, %c0_9] : memref<8x1xf32, #tpu.memory_space<vmem>>, vector<8x1xf32>
      %cst_10 = arith.constant 3.906250e-03 : f32
      %13 = vector.broadcast %cst_10 : f32 to vector<8x1xf32>
      %14 = arith.mulf %12, %13 : vector<8x1xf32>
      %c0_11 = arith.constant 0 : index
      %c0_12 = arith.constant 0 : index
      %15 = vector.load %arg3[%c0_11, %c0_12] : memref<8x1xf32, #tpu.memory_space<vmem>>, vector<8x1xf32>
      tpu.vector_store %arg3[%c0_11, %c0_12], %14 {strides = array<i32>} : memref<8x1xf32, #tpu.memory_space<vmem>>, vector<8x1xf32>,
    } else {
    }
    return
  }
  func.func @transform_0(%arg0: i32, %arg1: i32) -> (i32, i32) {
    %c0_i32 = arith.constant 0 : i32
    return %arg0, %arg1 : i32, i32
  }
  func.func @transform_1(%arg0: i32, %arg1: i32) -> (i32, i32) {
    %c0_i32 = arith.constant 0 : i32
    %c0_i32_0 = arith.constant 0 : i32
    return %arg0, %c0_i32 : i32, i32
  }
}

</mosaic_0001>

<bundles_post_ra>
// kernel: global_pool.1
= control target key start
LH: loop header
LB: loop body
LE: loop exit
PB: predicated region body
PF: predicated region fallthrough
CT: control target
= control target key end

     0   :  { %vm12_vm0 = vcmask 7168   ;;  %v34_v2 = vmov 0.0   ;;  %s54_s0 = inlined_call_operand.vmem [shape: f32[8,256], index: 0, kind: input, shape index: {}]   ;;  %s55_s1 = inlined_call_operand.vmem [shape: f32[8,1], index: 1, kind: output, shape index: {}]  }
   0x1   :  { %v14_v0 = vld [vmem:[%s54_s0] sm:$0xff]  ;;  %v15_v1 = vld [vmem:[%s54_s0 + $0x8] sm:$0xff]  ;;  %13 = vst.msk [vmem:[#allocation2] sm:$0xff] %vm12_vm0, %v34_v2 }
   0x2   :  { %v16_v3 = vadd.f32 %v15_v1, %v14_v0 }
   0x4   :  { %17 = vadd.xlane.f32.xlu0 %v16_v3 }
   0x8   :  { %v19_v4 = vld [vmem:[#allocation2] sm:$0xff] }
  0x8d   :  { %v18_v5 = vpop.xlane.xlu0 %17 }
  0x8e   :  { %v20_v6 = vadd.f32 %v19_v4, %v18_v5 }
  0x90   :  { %22 = vst.msk [vmem:[#allocation2] sm:$0xff] %vm12_vm0, %v20_v6 }
  0x97   :  { %v26_v7 = vld [vmem:[#allocation2] sm:$0xff] }
  0x98   :  { %v27_v8 = vmul.f32 0.00390625, %v26_v7 }
  0x9a   :  { %28 = vst.msk [vmem:[%s55_s1] sm:$0xff] %vm12_vm0, %v27_v8 }

</bundles_post_ra>
